<compile_context>
chip_gen: v5e
topology: v5e:2x2
jax: 0.10.0
libtpu: 0.0.40
codegen_flags: <defaults>
</compile_context>

<pallas_src>
import functools

import jax
import jax.numpy as jnp
from jax import lax
from jax.experimental import pallas as pl
from jax.experimental.pallas import tpu as pltpu

BN_EPS = 1e-5

# Explicit scoped-VMEM cap: below v7x's 64 MiB physical VMEM, above the
# 16 MiB (v5e) / 32 MiB (v6e, v7x) scoped defaults so big streamed tiles fit.
VMEM_LIMIT_BYTES = 48 * 1024 * 1024
# Target bytes per streamed-x buffer (the BlockSpec pipeline double-buffers
# it, so VMEM cost is ~2x this plus the small resident params/outputs).
STREAM_BUF_BYTES = 8 * 1024 * 1024


def _pool_kernel(x_ref, psum_ref, *, n_chunks, n_steps, s_valid, ragged):
    """Streams one (BC, tile_s) block of x, accumulating per-row partial sums
    into the resident lane-dense (BC, 128) output block of this parallel split."""
    s = pl.program_id(1)

    @pl.when(s == 0)
    def _init():
        psum_ref[...] = jnp.zeros_like(psum_ref)

    if ragged:
        p = pl.program_id(0)
        col0 = (p * n_steps + s) * (n_chunks * 128)          # global column base
        lane = lax.broadcasted_iota(jnp.int32, psum_ref.shape, 1)

    # Per-128-lane chunk loads (never materialize the whole tile in vregs),
    # combined through a 2-way accumulator tree to keep the add chain short.
    acc0 = jnp.zeros(psum_ref.shape, jnp.float32)
    acc1 = jnp.zeros(psum_ref.shape, jnp.float32)
    for j in range(n_chunks):                                  # static, = tile_s // 128
        chunk = x_ref[:, j * 128:(j + 1) * 128].astype(jnp.float32)
        if ragged:
            # Mask columns past the true spatial extent (OOB tail of the
            # partial last block contains unspecified data).
            chunk = jnp.where(col0 + j * 128 + lane < s_valid, chunk, 0.0)
        if j % 2 == 0:
            acc0 = acc0 + chunk
        else:
            acc1 = acc1 + chunk
    psum_ref[...] = psum_ref[...] + (acc0 + acc1)


def _finalize_kernel(psum_ref, sel_ref, e_ref, wp_ref, bp_ref, wb_ref, bb_ref,
                     gamma_ref, beta_ref, whp_ref, bhp_ref,
                     pred_ref, feat_ref, *, inv_s):
    """Tiny one-shot tail: pooled mean -> backbone projection -> bottleneck
    (Linear + BatchNorm1d with batch stats + ReLU) -> linear head."""
    # Combine the per-split partial sums and finish the spatial mean.
    tot = jnp.sum(psum_ref[...], axis=0)                       # (BC, 128)
    pooled = jnp.sum(tot, axis=1, keepdims=True) * inv_s       # (BC, 1)

    # Regroup (BC,1) -> (B,C) without an in-kernel reshape:
    #   E[r, c]   = 1 iff r % C == c   (one-hot channel id per row)
    #   sel[b, r] = 1 iff r // C == b  (batch-group membership)
    contrib = pooled * e_ref[...]                               # (BC, C)
    pooled_bc = jnp.dot(sel_ref[...], contrib,
                        preferred_element_type=jnp.float32)     # (B, C)

    # Backbone surrogate projection + ReLU.
    fb = jnp.dot(pooled_bc, wp_ref[...],
                 preferred_element_type=jnp.float32) + bp_ref[...]
    fb = jnp.maximum(fb, 0.0)                                   # (B, 512)

    # Bottleneck: Linear -> BatchNorm1d (batch statistics) -> ReLU.
    z = jnp.dot(fb, wb_ref[...],
                preferred_element_type=jnp.float32) + bb_ref[...]   # (B, Dbn)
    mean = jnp.mean(z, axis=0, keepdims=True)
    var = jnp.mean((z - mean) ** 2, axis=0, keepdims=True)          # biased
    zn = (z - mean) * lax.rsqrt(var + BN_EPS)
    f = jnp.maximum(zn * gamma_ref[...] + beta_ref[...], 0.0)
    feat_ref[...] = f

    # Head (weights zero-padded to a lane-dense 128-wide output).
    pred_ref[...] = jnp.dot(f, whp_ref[...],
                            preferred_element_type=jnp.float32) + bhp_ref[...]


def _auto_tile_s(s_cols, bc, itemsize):
    cap = max(128, (STREAM_BUF_BYTES // max(1, bc * itemsize)) // 128 * 128)
    return int(min(cap, max(128, (s_cols // 128) * 128)))


@functools.partial(jax.jit, static_argnames=("tile_s", "stream_dtype", "x_buffers"))
def classifier_forward(x, wp, bp, wb, bb, gamma, beta, wh, bh, *,
                       tile_s=None, stream_dtype=None, x_buffers=2):
    """x: [B, C, D, H, W].  Returns (predictions, features)."""
    B, C, D, H, W = x.shape
    S = D * H * W
    BC = B * C
    bottleneck_dim = wb.shape[1]
    num_classes = wh.shape[1]

    # Dense 2-D [BC, S] streaming layout.  No wrapper-side pad/cast by default:
    # an extra standalone pass over x would roughly halve throughput for this
    # HBM-bound kernel.
    x2 = x.reshape(BC, S)
    if stream_dtype is not None and x2.dtype != jnp.dtype(stream_dtype):
        # NOTE: only worthwhile if this cast fuses into x's producer upstream;
        # as a standalone XLA op it adds HBM traffic.
        x2 = x2.astype(stream_dtype)
    s_cols = S
    if s_cols < 128:
        # Tiny corner: pad up to one 128-lane tile (zeros don't perturb the sum).
        x2 = jnp.pad(x2, ((0, 0), (0, 128 - s_cols)))
        s_cols = 128

    itemsize = jnp.dtype(x2.dtype).itemsize
    if tile_s is None:
        tile_s = _auto_tile_s(s_cols, BC, itemsize)
    assert tile_s % 128 == 0
    tile_s = int(min(tile_s, max(128, (s_cols // 128) * 128)))

    n_total = -(-s_cols // tile_s)
    # Leading "parallel" axis: v7x's two TensorCores each stream half of S.
    # Only split when the step count divides evenly so every block starts
    # in-bounds; the masked ragged tail handles tile_s not dividing S.
    if n_total >= 2 and n_total % 2 == 0:
        n_split, n_steps = 2, n_total // 2
    else:
        n_split, n_steps = 1, n_total
    ragged = (n_split * n_steps * tile_s) != s_cols

    # Tiny host-side constants (no B-times-inflated copy of wp in VMEM).
    sel = jnp.kron(jnp.eye(B, dtype=jnp.float32),
                   jnp.ones((1, C), jnp.float32))               # (B, BC)
    e_mat = jnp.tile(jnp.eye(C, dtype=jnp.float32), (B, 1))     # (BC, C)

    # Lane-dense head output: pad classes to a multiple of 128, slice after.
    head_pad = ((num_classes + 127) // 128) * 128
    wh_pad = jnp.zeros((bottleneck_dim, head_pad), jnp.float32)
    wh_pad = wh_pad.at[:, :num_classes].set(wh)
    bh_pad = jnp.zeros((1, head_pad), jnp.float32).at[:, :num_classes].set(bh)

    x_spec_kwargs = {}
    if x_buffers != 2:          # optional deeper pipeline if DMA stays exposed
        x_spec_kwargs = dict(pipeline_mode=pl.Buffered(x_buffers))
    x_spec = pl.BlockSpec((BC, tile_s), lambda p, s: (0, p * n_steps + s),
                          **x_spec_kwargs)

    # ---- Stage 1: HBM-bound streaming pooled-sum reduction ----
    pool = functools.partial(_pool_kernel, n_chunks=tile_s // 128,
                             n_steps=n_steps, s_valid=s_cols, ragged=ragged)
    psum = pl.pallas_call(
        pool,
        out_shape=jax.ShapeDtypeStruct((n_split, BC, 128), jnp.float32),
        grid=(n_split, n_steps),
        in_specs=[x_spec],
        out_specs=pl.BlockSpec((None, BC, 128), lambda p, s: (p, 0, 0)),
        compiler_params=pltpu.CompilerParams(
            dimension_semantics=("parallel", "arbitrary"),
            vmem_limit_bytes=VMEM_LIMIT_BYTES),
        cost_estimate=pl.CostEstimate(
            flops=int(2 * BC * s_cols),
            transcendentals=0,
            bytes_accessed=int(x2.size * itemsize + n_split * BC * 128 * 4)),
    )(x2)

    # ---- Stage 2: tiny one-shot finalize (projection + bottleneck + BN + head) ----
    finalize = functools.partial(_finalize_kernel, inv_s=1.0 / float(S))
    preds_pad, feats = pl.pallas_call(
        finalize,
        out_shape=(jax.ShapeDtypeStruct((B, head_pad), jnp.float32),
                   jax.ShapeDtypeStruct((B, bottleneck_dim), jnp.float32)),
    )(psum, sel, e_mat, wp, bp, wb, bb, gamma, beta, wh_pad, bh_pad)

    return preds_pad[:, :num_classes], feats


def reference_forward(x, wp, bp, wb, bb, gamma, beta, wh, bh):
    B, C = x.shape[:2]
    hp = lax.Precision.HIGHEST
    pooled = jnp.mean(x.reshape(B, C, -1), axis=-1)
    fb = jnp.maximum(jnp.dot(pooled, wp, precision=hp) + bp, 0.0)
    z = jnp.dot(fb, wb, precision=hp) + bb
    mean = jnp.mean(z, axis=0, keepdims=True)
    var = jnp.mean((z - mean) ** 2, axis=0, keepdims=True)
    f = jnp.maximum((z - mean) / jnp.sqrt(var + BN_EPS) * gamma + beta, 0.0)
    return jnp.dot(f, wh, precision=hp) + bh, f


if __name__ == "__main__":
    B, C, D, H, W = 4, 4, 8, 16, 16
    BACKBONE_DIM = 512          # resnet18 output_dim
    BOTTLENECK_DIM = 256        # args.bottleneck_dim
    NUM_CLASSES = 4             # args.num_classes

    key = jax.random.PRNGKey(0)
    keys = jax.random.split(key, 8)

    x = jax.random.normal(keys[0], (B, C, D, H, W), dtype=jnp.float32)
    wp = jax.random.normal(keys[1], (C, BACKBONE_DIM), jnp.float32) * 0.1
    bp = jax.random.normal(keys[2], (1, BACKBONE_DIM), jnp.float32) * 0.01
    wb = jax.random.normal(keys[3], (BACKBONE_DIM, BOTTLENECK_DIM),
                           jnp.float32) * 0.05
    bb = jax.random.normal(keys[4], (1, BOTTLENECK_DIM), jnp.float32) * 0.01
    gamma = jnp.ones((1, BOTTLENECK_DIM), jnp.float32)      # BatchNorm weight
    beta = jnp.zeros((1, BOTTLENECK_DIM), jnp.float32)      # BatchNorm bias
    wh = jax.random.normal(keys[5], (BOTTLENECK_DIM, NUM_CLASSES),
                           jnp.float32) * 0.05
    bh = jax.random.normal(keys[6], (1, NUM_CLASSES), jnp.float32) * 0.01

    ref_preds, ref_feats = reference_forward(x, wp, bp, wb, bb, gamma, beta,
                                             wh, bh)

    # 1) Default path: auto tile -> single (BC, S) block, one grid step.
    preds, feats = classifier_forward(x, wp, bp, wb, bb, gamma, beta, wh, bh)
    jax.block_until_ready((preds, feats))
    assert preds.shape == (B, NUM_CLASSES) and feats.shape == (B, BOTTLENECK_DIM)
    assert jnp.allclose(preds, ref_preds, atol=2e-3, rtol=2e-3)
    assert jnp.allclose(feats, ref_feats, atol=2e-3, rtol=2e-3)

    # 2) Multi-step + parallel S-split (v7x two-TC layout): grid (2, 4).
    preds2, feats2 = classifier_forward(x, wp, bp, wb, bb, gamma, beta, wh, bh,
                                        tile_s=256)
    jax.block_until_ready((preds2, feats2))
    assert jnp.allclose(preds2, ref_preds, atol=2e-3, rtol=2e-3)
    assert jnp.allclose(feats2, ref_feats, atol=2e-3, rtol=2e-3)

    # 3) Ragged tail (tile_s does not divide S): masked last block, no jnp.pad.
    preds3, feats3 = classifier_forward(x, wp, bp, wb, bb, gamma, beta, wh, bh,
                                        tile_s=768)
    jax.block_until_ready((preds3, feats3))
    assert jnp.allclose(preds3, ref_preds, atol=2e-3, rtol=2e-3)
    assert jnp.allclose(feats3, ref_feats, atol=2e-3, rtol=2e-3)

    print("KERNEL_OK")
</pallas_src>

<mosaic_0001>
module attributes {stable_mosaic.version = 11 : i64} {
  func.func @_pool_kernel(%arg0: i32, %arg1: i32, %arg2: memref<16x2048xf32, #tpu.memory_space<vmem>>, %arg3: memref<1x16x128xf32, #tpu.memory_space<vmem>>) attributes {dimension_semantics = [#tpu.dimension_semantics<parallel>, #tpu.dimension_semantics<arbitrary>], iteration_bounds = array<i64: 1, 1>, scalar_prefetch = 0 : i64, scratch_operands = 0 : i64, tpu.core_type = #tpu.core_type<tc>, window_params = [{transform_indices = @transform_0, window_bounds = array<i64: 16, 2048>}, {transform_indices = @transform_1, window_bounds = array<i64: 1, 16, 128>}]} {
    %c0_i32 = arith.constant 0 : i32
    %0 = arith.cmpi eq, %arg1, %c0_i32 : i32
    %1 = arith.extui %0 : i1 to i32
    %c0_i32_0 = arith.constant 0 : i32
    %2 = arith.cmpi ne, %1, %c0_i32_0 : i32
    scf.if %2 {
      %cst_24 = arith.constant 0.000000e+00 : f32
      %44 = vector.broadcast %cst_24 : f32 to vector<16x128xf32>
      %c0_25 = arith.constant 0 : index
      %c0_26 = arith.constant 0 : index
      %c0_27 = arith.constant 0 : index
      %45 = vector.load %arg3[%c0_25, %c0_26, %c0_27] : memref<1x16x128xf32, #tpu.memory_space<vmem>>, vector<1x16x128xf32>
      %46 = vector.shape_cast %45 : vector<1x16x128xf32> to vector<16x128xf32>
      %47 = vector.shape_cast %44 : vector<16x128xf32> to vector<1x16x128xf32>
      tpu.vector_store %arg3[%c0_25, %c0_26, %c0_27], %47 {strides = array<i32>} : memref<1x16x128xf32, #tpu.memory_space<vmem>>, vector<1x16x128xf32>,
    } else {
    }
    %cst = arith.constant 0.000000e+00 : f32
    %3 = vector.broadcast %cst : f32 to vector<16x128xf32>
    %cst_1 = arith.constant 0.000000e+00 : f32
    %4 = vector.broadcast %cst_1 : f32 to vector<16x128xf32>
    %c0 = arith.constant 0 : index
    %c0_2 = arith.constant 0 : index
    %5 = vector.load %arg2[%c0, %c0_2] : memref<16x2048xf32, #tpu.memory_space<vmem>>, vector<16x128xf32>
    %6 = arith.addf %3, %5 : vector<16x128xf32>
    %c0_3 = arith.constant 0 : index
    %c128 = arith.constant 128 : index
    %7 = vector.load %arg2[%c0_3, %c128] : memref<16x2048xf32, #tpu.memory_space<vmem>>, vector<16x128xf32>
    %8 = arith.addf %4, %7 : vector<16x128xf32>
    %c0_4 = arith.constant 0 : index
    %c256 = arith.constant 256 : index
    %9 = vector.load %arg2[%c0_4, %c256] : memref<16x2048xf32, #tpu.memory_space<vmem>>, vector<16x128xf32>
    %10 = arith.addf %6, %9 : vector<16x128xf32>
    %c0_5 = arith.constant 0 : index
    %c384 = arith.constant 384 : index
    %11 = vector.load %arg2[%c0_5, %c384] : memref<16x2048xf32, #tpu.memory_space<vmem>>, vector<16x128xf32>
    %12 = arith.addf %8, %11 : vector<16x128xf32>
    %c0_6 = arith.constant 0 : index
    %c512 = arith.constant 512 : index
    %13 = vector.load %arg2[%c0_6, %c512] : memref<16x2048xf32, #tpu.memory_space<vmem>>, vector<16x128xf32>
    %14 = arith.addf %10, %13 : vector<16x128xf32>
    %c0_7 = arith.constant 0 : index
    %c640 = arith.constant 640 : index
    %15 = vector.load %arg2[%c0_7, %c640] : memref<16x2048xf32, #tpu.memory_space<vmem>>, vector<16x128xf32>
    %16 = arith.addf %12, %15 : vector<16x128xf32>
    %c0_8 = arith.constant 0 : index
    %c768 = arith.constant 768 : index
    %17 = vector.load %arg2[%c0_8, %c768] : memref<16x2048xf32, #tpu.memory_space<vmem>>, vector<16x128xf32>
    %18 = arith.addf %14, %17 : vector<16x128xf32>
    %c0_9 = arith.constant 0 : index
    %c896 = arith.constant 896 : index
    %19 = vector.load %arg2[%c0_9, %c896] : memref<16x2048xf32, #tpu.memory_space<vmem>>, vector<16x128xf32>
    %20 = arith.addf %16, %19 : vector<16x128xf32>
    %c0_10 = arith.constant 0 : index
    %c1024 = arith.constant 1024 : index
    %21 = vector.load %arg2[%c0_10, %c1024] : memref<16x2048xf32, #tpu.memory_space<vmem>>, vector<16x128xf32>
    %22 = arith.addf %18, %21 : vector<16x128xf32>
    %c0_11 = arith.constant 0 : index
    %c1152 = arith.constant 1152 : index
    %23 = vector.load %arg2[%c0_11, %c1152] : memref<16x2048xf32, #tpu.memory_space<vmem>>, vector<16x128xf32>
    %24 = arith.addf %20, %23 : vector<16x128xf32>
    %c0_12 = arith.constant 0 : index
    %c1280 = arith.constant 1280 : index
    %25 = vector.load %arg2[%c0_12, %c1280] : memref<16x2048xf32, #tpu.memory_space<vmem>>, vector<16x128xf32>
    %26 = arith.addf %22, %25 : vector<16x128xf32>
    %c0_13 = arith.constant 0 : index
    %c1408 = arith.constant 1408 : index
    %27 = vector.load %arg2[%c0_13, %c1408] : memref<16x2048xf32, #tpu.memory_space<vmem>>, vector<16x128xf32>
    %28 = arith.addf %24, %27 : vector<16x128xf32>
    %c0_14 = arith.constant 0 : index
    %c1536 = arith.constant 1536 : index
    %29 = vector.load %arg2[%c0_14, %c1536] : memref<16x2048xf32, #tpu.memory_space<vmem>>, vector<16x128xf32>
    %30 = arith.addf %26, %29 : vector<16x128xf32>
    %c0_15 = arith.constant 0 : index
    %c1664 = arith.constant 1664 : index
    %31 = vector.load %arg2[%c0_15, %c1664] : memref<16x2048xf32, #tpu.memory_space<vmem>>, vector<16x128xf32>
    %32 = arith.addf %28, %31 : vector<16x128xf32>
    %c0_16 = arith.constant 0 : index
    %c1792 = arith.constant 1792 : index
    %33 = vector.load %arg2[%c0_16, %c1792] : memref<16x2048xf32, #tpu.memory_space<vmem>>, vector<16x128xf32>
    %34 = arith.addf %30, %33 : vector<16x128xf32>
    %c0_17 = arith.constant 0 : index
    %c1920 = arith.constant 1920 : index
    %35 = vector.load %arg2[%c0_17, %c1920] : memref<16x2048xf32, #tpu.memory_space<vmem>>, vector<16x128xf32>
    %36 = arith.addf %32, %35 : vector<16x128xf32>
    %c0_18 = arith.constant 0 : index
    %c0_19 = arith.constant 0 : index
    %c0_20 = arith.constant 0 : index
    %37 = vector.load %arg3[%c0_18, %c0_19, %c0_20] : memref<1x16x128xf32, #tpu.memory_space<vmem>>, vector<1x16x128xf32>
    %38 = vector.shape_cast %37 : vector<1x16x128xf32> to vector<16x128xf32>
    %39 = arith.addf %34, %36 : vector<16x128xf32>
    %40 = arith.addf %38, %39 : vector<16x128xf32>
    %c0_21 = arith.constant 0 : index
    %c0_22 = arith.constant 0 : index
    %c0_23 = arith.constant 0 : index
    %41 = vector.load %arg3[%c0_21, %c0_22, %c0_23] : memref<1x16x128xf32, #tpu.memory_space<vmem>>, vector<1x16x128xf32>
    %42 = vector.shape_cast %41 : vector<1x16x128xf32> to vector<16x128xf32>
    %43 = vector.shape_cast %40 : vector<16x128xf32> to vector<1x16x128xf32>
    tpu.vector_store %arg3[%c0_21, %c0_22, %c0_23], %43 {strides = array<i32>} : memref<1x16x128xf32, #tpu.memory_space<vmem>>, vector<1x16x128xf32>,
    return
  }
  func.func @transform_0(%arg0: i32, %arg1: i32) -> (i32, i32) {
    %c1_i32 = arith.constant 1 : i32
    %0 = arith.muli %arg0, %c1_i32 : i32
    %1 = arith.addi %0, %arg1 : i32
    %c0_i32 = arith.constant 0 : i32
    %c0_i32_0 = arith.constant 0 : i32
    return %c0_i32, %1 : i32, i32
  }
  func.func @transform_1(%arg0: i32, %arg1: i32) -> (i32, i32, i32) {
    %c0_i32 = arith.constant 0 : i32
    %c0_i32_0 = arith.constant 0 : i32
    %c0_i32_1 = arith.constant 0 : i32
    return %arg0, %c0_i32, %c0_i32_0 : i32, i32, i32
  }
}

module attributes {stable_mosaic.version = 11 : i64} {
  func.func @_finalize_kernel(%arg0: memref<1x16x128xf32, #tpu.memory_space<vmem>>, %arg1: memref<4x16xf32, #tpu.memory_space<vmem>>, %arg2: memref<16x4xf32, #tpu.memory_space<vmem>>, %arg3: memref<4x512xf32, #tpu.memory_space<vmem>>, %arg4: memref<1x512xf32, #tpu.memory_space<vmem>>, %arg5: memref<512x256xf32, #tpu.memory_space<vmem>>, %arg6: memref<1x256xf32, #tpu.memory_space<vmem>>, %arg7: memref<1x256xf32, #tpu.memory_space<vmem>>, %arg8: memref<1x256xf32, #tpu.memory_space<vmem>>, %arg9: memref<256x128xf32, #tpu.memory_space<vmem>>, %arg10: memref<1x128xf32, #tpu.memory_space<vmem>>, %arg11: memref<4x128xf32, #tpu.memory_space<vmem>>, %arg12: memref<4x256xf32, #tpu.memory_space<vmem>>) attributes {dimension_semantics = [], scalar_prefetch = 0 : i64, scratch_operands = 0 : i64, tpu.core_type = #tpu.core_type<tc>} {
    %c0 = arith.constant 0 : index
    %c0_0 = arith.constant 0 : index
    %c0_1 = arith.constant 0 : index
    %0 = vector.load %arg0[%c0, %c0_0, %c0_1] : memref<1x16x128xf32, #tpu.memory_space<vmem>>, vector<1x16x128xf32>
    %cst = arith.constant dense<0.000000e+00> : vector<16x128xf32>
    %1 = vector.multi_reduction <add>, %0, %cst [0] : vector<1x16x128xf32> to vector<16x128xf32>
    %cst_2 = arith.constant dense<0.000000e+00> : vector<16xf32>
    %2 = vector.multi_reduction <add>, %1, %cst_2 [1] : vector<16x128xf32> to vector<16xf32>
    %3 = vector.shape_cast %2 : vector<16xf32> to vector<16x1xf32>
    %cst_3 = arith.constant 4.8828125E-4 : f32
    %4 = vector.broadcast %cst_3 : f32 to vector<16x1xf32>
    %5 = arith.mulf %3, %4 : vector<16x1xf32>
    %c0_4 = arith.constant 0 : index
    %c0_5 = arith.constant 0 : index
    %6 = vector.load %arg2[%c0_4, %c0_5] : memref<16x4xf32, #tpu.memory_space<vmem>>, vector<16x4xf32>
    %7 = vector.broadcast %5 : vector<16x1xf32> to vector<16x4xf32>
    %8 = arith.mulf %7, %6 : vector<16x4xf32>
    %c0_6 = arith.constant 0 : index
    %c0_7 = arith.constant 0 : index
    %9 = vector.load %arg1[%c0_6, %c0_7] : memref<4x16xf32, #tpu.memory_space<vmem>>, vector<4x16xf32>
    %cst_8 = arith.constant dense<0.000000e+00> : vector<4x4xf32>
    %10 = tpu.matmul %9, %8, %cst_8 {dimension_numbers = #tpu.dot_dimension_numbers<[1], [0], [0], [1], [0, 0, 1, 1], [], []>} : vector<4x16xf32>, vector<16x4xf32>, vector<4x4xf32> -> vector<4x4xf32>
    %c0_9 = arith.constant 0 : index
    %c0_10 = arith.constant 0 : index
    %11 = vector.load %arg3[%c0_9, %c0_10] : memref<4x512xf32, #tpu.memory_space<vmem>>, vector<4x512xf32>
    %cst_11 = arith.constant dense<0.000000e+00> : vector<4x512xf32>
    %12 = tpu.matmul %10, %11, %cst_11 {dimension_numbers = #tpu.dot_dimension_numbers<[1], [0], [0], [1], [0, 0, 1, 1], [], []>} : vector<4x4xf32>, vector<4x512xf32>, vector<4x512xf32> -> vector<4x512xf32>
    %c0_12 = arith.constant 0 : index
    %c0_13 = arith.constant 0 : index
    %13 = vector.load %arg4[%c0_12, %c0_13] : memref<1x512xf32, #tpu.memory_space<vmem>>, vector<1x512xf32>
    %14 = vector.broadcast %13 : vector<1x512xf32> to vector<4x512xf32>
    %15 = arith.addf %12, %14 : vector<4x512xf32>
    %cst_14 = arith.constant 0.000000e+00 : f32
    %16 = vector.broadcast %cst_14 : f32 to vector<4x512xf32>
    %17 = arith.maximumf %15, %16 : vector<4x512xf32>
    %c0_15 = arith.constant 0 : index
    %c0_16 = arith.constant 0 : index
    %18 = vector.load %arg5[%c0_15, %c0_16] : memref<512x256xf32, #tpu.memory_space<vmem>>, vector<512x256xf32>
    %cst_17 = arith.constant dense<0.000000e+00> : vector<4x256xf32>
    %19 = tpu.matmul %17, %18, %cst_17 {dimension_numbers = #tpu.dot_dimension_numbers<[1], [0], [0], [1], [0, 0, 1, 1], [], []>} : vector<4x512xf32>, vector<512x256xf32>, vector<4x256xf32> -> vector<4x256xf32>
    %c0_18 = arith.constant 0 : index
    %c0_19 = arith.constant 0 : index
    %20 = vector.load %arg6[%c0_18, %c0_19] : memref<1x256xf32, #tpu.memory_space<vmem>>, vector<1x256xf32>
    %21 = vector.broadcast %20 : vector<1x256xf32> to vector<4x256xf32>
    %22 = arith.addf %19, %21 : vector<4x256xf32>
    %cst_20 = arith.constant dense<0.000000e+00> : vector<256xf32>
    %23 = vector.multi_reduction <add>, %22, %cst_20 [0] : vector<4x256xf32> to vector<256xf32>
    %24 = vector.shape_cast %23 : vector<256xf32> to vector<1x256xf32>
    %cst_21 = arith.constant 4.000000e+00 : f32
    %25 = vector.broadcast %cst_21 : f32 to vector<1x256xf32>
    %26 = arith.divf %24, %25 : vector<1x256xf32>
    %27 = vector.broadcast %26 : vector<1x256xf32> to vector<4x256xf32>
    %28 = arith.subf %22, %27 : vector<4x256xf32>
    %29 = arith.mulf %28, %28 : vector<4x256xf32>
    %cst_22 = arith.constant dense<0.000000e+00> : vector<256xf32>
    %30 = vector.multi_reduction <add>, %29, %cst_22 [0] : vector<4x256xf32> to vector<256xf32>
    %31 = vector.shape_cast %30 : vector<256xf32> to vector<1x256xf32>
    %cst_23 = arith.constant 4.000000e+00 : f32
    %32 = vector.broadcast %cst_23 : f32 to vector<1x256xf32>
    %33 = arith.divf %31, %32 : vector<1x256xf32>
    %34 = vector.broadcast %26 : vector<1x256xf32> to vector<4x256xf32>
    %35 = arith.subf %22, %34 : vector<4x256xf32>
    %cst_24 = arith.constant 9.99999974E-6 : f32
    %36 = vector.broadcast %cst_24 : f32 to vector<1x256xf32>
    %37 = arith.addf %33, %36 : vector<1x256xf32>
    %38 = math.rsqrt %37 : vector<1x256xf32>
    %39 = vector.broadcast %38 : vector<1x256xf32> to vector<4x256xf32>
    %40 = arith.mulf %35, %39 : vector<4x256xf32>
    %c0_25 = arith.constant 0 : index
    %c0_26 = arith.constant 0 : index
    %41 = vector.load %arg7[%c0_25, %c0_26] : memref<1x256xf32, #tpu.memory_space<vmem>>, vector<1x256xf32>
    %42 = vector.broadcast %41 : vector<1x256xf32> to vector<4x256xf32>
    %43 = arith.mulf %40, %42 : vector<4x256xf32>
    %c0_27 = arith.constant 0 : index
    %c0_28 = arith.constant 0 : index
    %44 = vector.load %arg8[%c0_27, %c0_28] : memref<1x256xf32, #tpu.memory_space<vmem>>, vector<1x256xf32>
    %45 = vector.broadcast %44 : vector<1x256xf32> to vector<4x256xf32>
    %46 = arith.addf %43, %45 : vector<4x256xf32>
    %cst_29 = arith.constant 0.000000e+00 : f32
    %47 = vector.broadcast %cst_29 : f32 to vector<4x256xf32>
    %48 = arith.maximumf %46, %47 : vector<4x256xf32>
    %c0_30 = arith.constant 0 : index
    %c0_31 = arith.constant 0 : index
    %49 = vector.load %arg12[%c0_30, %c0_31] : memref<4x256xf32, #tpu.memory_space<vmem>>, vector<4x256xf32>
    tpu.vector_store %arg12[%c0_30, %c0_31], %48 {strides = array<i32>} : memref<4x256xf32, #tpu.memory_space<vmem>>, vector<4x256xf32>,
    %c0_32 = arith.constant 0 : index
    %c0_33 = arith.constant 0 : index
    %50 = vector.load %arg9[%c0_32, %c0_33] : memref<256x128xf32, #tpu.memory_space<vmem>>, vector<256x128xf32>
    %cst_34 = arith.constant dense<0.000000e+00> : vector<4x128xf32>
    %51 = tpu.matmul %48, %50, %cst_34 {dimension_numbers = #tpu.dot_dimension_numbers<[1], [0], [0], [1], [0, 0, 1, 1], [], []>} : vector<4x256xf32>, vector<256x128xf32>, vector<4x128xf32> -> vector<4x128xf32>
    %c0_35 = arith.constant 0 : index
    %c0_36 = arith.constant 0 : index
    %52 = vector.load %arg10[%c0_35, %c0_36] : memref<1x128xf32, #tpu.memory_space<vmem>>, vector<1x128xf32>
    %53 = vector.broadcast %52 : vector<1x128xf32> to vector<4x128xf32>
    %54 = arith.addf %51, %53 : vector<4x128xf32>
    %c0_37 = arith.constant 0 : index
    %c0_38 = arith.constant 0 : index
    %55 = vector.load %arg11[%c0_37, %c0_38] : memref<4x128xf32, #tpu.memory_space<vmem>>, vector<4x128xf32>
    tpu.vector_store %arg11[%c0_37, %c0_38], %54 {strides = array<i32>} : memref<4x128xf32, #tpu.memory_space<vmem>>, vector<4x128xf32>,
    return
  }
}

</mosaic_0001>

<bundles_post_ra>
// kernel: classifier_forward.2
= control target key start
LH: loop header
LB: loop body
LE: loop exit
PB: predicated region body
PF: predicated region fallthrough
CT: control target
= control target key end

     0   :  { %s231_s0 = inlined_call_operand.vmem [shape: f32[16,2048], index: 0, kind: input, shape index: {}]   ;;  %s232_s1 = inlined_call_operand.vmem [shape: f32[1,16,128], index: 1, kind: output, shape index: {}]  }
   0x1   :  { %v36_v0 = vld [vmem:[%s231_s0] sm:$0xff]  ;;  %v40_v1 = vld [vmem:[%s231_s0 + $0x8] sm:$0xff]  ;;  %v44_v2 = vld [vmem:[%s231_s0 + $0x10] sm:$0xff] }
   0x2   :  { %v46_v3 = vadd.f32 %v44_v2, %v36_v0  ;;  %v48_v4 = vld [vmem:[%s231_s0 + $0x18] sm:$0xff]  ;;  %v52_v5 = vld [vmem:[%s231_s0 + $0x20] sm:$0xff]  ;;  %v56_v6 = vld [vmem:[%s231_s0 + $0x28] sm:$0xff] }
   0x3   :  { %v50_v7 = vadd.f32 %v48_v4, %v40_v1  ;;  %v60_v8 = vld [vmem:[%s231_s0 + $0x30] sm:$0xff]  ;;  %v64_v10 = vld [vmem:[%s231_s0 + $0x38] sm:$0xff]  ;;  %v68_v12 = vld [vmem:[%s231_s0 + $0x40] sm:$0xff] }
   0x4   :  { %v54_v9 = vadd.f32 %v52_v5, %v46_v3  ;;  %v72_v13 = vld [vmem:[%s231_s0 + $0x48] sm:$0xff]  ;;  %v76_v15 = vld [vmem:[%s231_s0 + $0x50] sm:$0xff]  ;;  %v37_v16 = vld [vmem:[%s231_s0 + $0x80] sm:$0xff] }
   0x5   :  { %v58_v11 = vadd.f32 %v56_v6, %v50_v7  ;;  %v41_v17 = vld [vmem:[%s231_s0 + $0x88] sm:$0xff]  ;;  %v45_v19 = vld [vmem:[%s231_s0 + $0x90] sm:$0xff]  ;;  %v49_v20 = vld [vmem:[%s231_s0 + $0x98] sm:$0xff] }
   0x6   :  { %v62_v14 = vadd.f32 %v60_v8, %v54_v9  ;;  %v53_v21 = vld [vmem:[%s231_s0 + $0xa0] sm:$0xff]  ;;  %v80_v23 = vld [vmem:[%s231_s0 + $0x58] sm:$0xff]  ;;  %v47_v24 = vadd.f32 %v45_v19, %v37_v16  ;;  %v51_v25 = vadd.f32 %v49_v20, %v41_v17  ;;  %v57_v26 = vld [vmem:[%s231_s0 + $0xa8] sm:$0xff] }
   0x7   :  { %v66_v18 = vadd.f32 %v64_v10, %v58_v11  ;;  %v84_v28 = vld [vmem:[%s231_s0 + $0x60] sm:$0xff]  ;;  %v61_v29 = vld [vmem:[%s231_s0 + $0xb0] sm:$0xff]  ;;  %v65_v30 = vld [vmem:[%s231_s0 + $0xb8] sm:$0xff] }
   0x8   :  { %v70_v22 = vadd.f32 %v68_v12, %v62_v14  ;;  %v88_v32 = vld [vmem:[%s231_s0 + $0x68] sm:$0xff]  ;;  %v55_v33 = vadd.f32 %v53_v21, %v47_v24  ;;  %v59_v34 = vadd.f32 %v57_v26, %v51_v25  ;;  %v92_v36 = vld [vmem:[%s231_s0 + $0x70] sm:$0xff]  ;;  %v69_v37 = vld [vmem:[%s231_s0 + $0xc0] sm:$0xff] }
   0x9   :  { %v74_v27 = vadd.f32 %v72_v13, %v66_v18  ;;  %v73_v38 = vld [vmem:[%s231_s0 + $0xc8] sm:$0xff]  ;;  %v96_v40 = vld [vmem:[%s231_s0 + $0x78] sm:$0xff]  ;;  %v77_v44 = vld [vmem:[%s231_s0 + $0xd0] sm:$0xff] }
   0xa   :  { %v78_v31 = vadd.f32 %v76_v15, %v70_v22  ;;  %v63_v41 = vadd.f32 %v61_v29, %v55_v33  ;;  %v67_v42 = vadd.f32 %v65_v30, %v59_v34  ;;  %v81_v45 = vld [vmem:[%s231_s0 + $0xd8] sm:$0xff]  ;;  %v85_v50 = vld [vmem:[%s231_s0 + $0xe0] sm:$0xff]  ;;  %v89_v51 = vld [vmem:[%s231_s0 + $0xe8] sm:$0xff] }
   0xb   :  { %v82_v35 = vadd.f32 %v80_v23, %v74_v27  ;;  %v93_v55 = vld [vmem:[%s231_s0 + $0xf0] sm:$0xff]  ;;  %v97_v56 = vld [vmem:[%s231_s0 + $0xf8] sm:$0xff] }
   0xc   :  { %v86_v39 = vadd.f32 %v84_v28, %v78_v31  ;;  %v71_v47 = vadd.f32 %v69_v37, %v63_v41  ;;  %v75_v48 = vadd.f32 %v73_v38, %v67_v42 }
   0xd   :  { %v90_v43 = vadd.f32 %v88_v32, %v82_v35 }
   0xe   :  { %v94_v46 = vadd.f32 %v92_v36, %v86_v39  ;;  %v79_v52 = vadd.f32 %v77_v44, %v71_v47  ;;  %v83_v53 = vadd.f32 %v81_v45, %v75_v48 }
   0xf   :  { %v98_v49 = vadd.f32 %v96_v40, %v90_v43 }
  0x10   :  { %v87_v57 = vadd.f32 %v85_v50, %v79_v52  ;;  %v91_v58 = vadd.f32 %v89_v51, %v83_v53 }
  0x11   :  { %v102_v54 = vadd.f32 %v98_v49, %v94_v46 }
  0x12   :  { %v95_v59 = vadd.f32 %v93_v55, %v87_v57  ;;  %v99_v60 = vadd.f32 %v97_v56, %v91_v58 }
  0x13   :  { %106 = vst [vmem:[%s232_s1] sm:$0xff] %v102_v54 }
  0x14   :  { %v103_v61 = vadd.f32 %v99_v60, %v95_v59 }
  0x16   :  { %107 = vst [vmem:[%s232_s1 + $0x8] sm:$0xff] %v103_v61 }

// kernel: classifier_forward.3
= control target key start
LH: loop header
LB: loop body
LE: loop exit
PB: predicated region body
PF: predicated region fallthrough
CT: control target
= control target key end

     0   :  { %18 = vsyncpa [#allocation3], 0  ;;  %s1383_s0 = inlined_call_operand.vmem [shape: f32[1,16,128], index: 0, kind: input, shape index: {}]   ;;  %s1384_s1 = inlined_call_operand.vmem [shape: f32[4,16], index: 1, kind: input, shape index: {}]   ;;  %s1385_s2 = inlined_call_operand.vmem [shape: f32[16,4], index: 2, kind: input, shape index: {}]   ;;  %s1386_s3 = inlined_call_operand.vmem [shape: f32[4,512], index: 3, kind: input, shape index: {}]   ;;  %s1387_s4 = inlined_call_operand.vmem [shape: f32[1,512], index: 4, kind: input, shape index: {}]   ;;  %s1388_s5 = inlined_call_operand.vmem [shape: f32[512,256], index: 5, kind: input, shape index: {}]   ;;  %s1389_s6 = inlined_call_operand.vmem [shape: f32[1,256], index: 6, kind: input, shape index: {}]   ;;  %s1390_s7 = inlined_call_operand.vmem [shape: f32[1,256], index: 7, kind: input, shape index: {}]   ;;  %s1391_s8 = inlined_call_operand.vmem [shape: f32[1,256], index: 8, kind: input, shape index: {}]   ;;  %s1392_s9 = inlined_call_operand.vmem [shape: f32[256,128], index: 9, kind: input, shape index: {}]   ;;  %s1393_s10 = inlined_call_operand.vmem [shape: f32[1,128], index: 10, kind: input, shape index: {}]   ;;  %s1394_s11 = inlined_call_operand.hbm [shape: f32[4,128], index: 11, kind: output, shape index: {0}]   ;;  %s1395_s12 = inlined_call_operand.hbm [shape: f32[4,256], index: 12, kind: output, shape index: {1}]  }
   0x1   :  { %v43_v0 = vld [vmem:[%s1383_s0 + $0x8] sm:$0xff] }
   0x2   :  { %48 = vadd.xlane.f32.xlu0 %v43_v0 }
   0x3   :  { %19 = vsyncpa [#allocation5], 0  ;;  %v42_v1 = vld [vmem:[%s1383_s0] sm:$0xff]  ;;  %v53_v4 = vld [vmem:[%s1385_s2 + $0x8] sm:$0xff]  ;;  %vm57_vm0 = vcmask 130048   ;;  %vm106_vm1 = vcmask 1043456  }
   0x4   :  { %v81_v2 = vld [vmem:[%s1386_s3] sm:$0xff]  ;;  %v82_v14 = vld [vmem:[%s1386_s3 + $0x8] sm:$0xff]  ;;  %v229_v16 = vld [vmem:[%s1388_s5 + $0xf0] sm:$0xff]  ;;  %vm102_vm2 = vcmask 31744   ;;  %s679_s25 = sshll.u32 %s1395_s12, 4  ;;  %s766_s28 = smov [#allocation2]   ;;  %s680_s25 = int_to_ptr.hbm [resolvable:$true] %s679_s25 }
   0x5   :  { %95 = vst [vmem:[#allocation1] ss:$2 sm:$0xff] %v81_v2  ;;  %v52_v8 = vld [vmem:[%s1385_s2] sm:$0xff]  ;;  %v261_v17 = vld [vmem:[%s1388_s5 + $0x1f0] sm:$0xff]  ;;  %333 = vmatpush.msra.mxu2 %v229_v16  ;;  %v256_v16 = vld [vmem:[%s1388_s5 + $0x1c8] sm:$0xff] }
   0x6   :  { %v56_v11 = vld [vmem:[%s1384_s1] sm:$0xf]  ;;  %97 = vst [vmem:[#allocation1 + $0x10] ss:$2 sm:$0xff] %v82_v14  ;;  %353 = vmatpush.msra.mxu3 %v261_v17  ;;  %v225_v20 = vld [vmem:[%s1388_s5 + $0xd0] sm:$0xff] }
   0x7   :  { %v227_v18 = vld [vmem:[%s1388_s5 + $0xe0] sm:$0xff]  ;;  %v257_v21 = vld [vmem:[%s1388_s5 + $0x1d0] sm:$0xff] }
   0x8   :  { %v259_v19 = vld [vmem:[%s1388_s5 + $0x1e0] sm:$0xff]  ;;  %334 = vmatpush.msra.mxu2 %v227_v18  ;;  %v293_v22 = vld [vmem:[%s1388_s5 + $0x2f0] sm:$0xff] }
   0x9   :  { %354 = vmatpush.msra.mxu3 %v259_v19  ;;  %v223_v23 = vld [vmem:[%s1388_s5 + $0xc0] sm:$0xff]  ;;  %v289_v26 = vld [vmem:[%s1388_s5 + $0x2d0] sm:$0xff]  ;;  %v222_v19 = vld [vmem:[%s1388_s5 + $0xb8] sm:$0xff] }
   0xa   :  { %46 = vadd.xlane.f32.xlu0 %v42_v1  ;;  %v255_v24 = vld [vmem:[%s1388_s5 + $0x1c0] sm:$0xff]  ;;  %335 = vmatpush.msra.mxu2 %v225_v20  ;;  %v221_v27 = vld [vmem:[%s1388_s5 + $0xb0] sm:$0xff]  ;;  %v254_v20 = vld [vmem:[%s1388_s5 + $0x1b8] sm:$0xff] }
   0xb   :  { %v291_v25 = vld [vmem:[%s1388_s5 + $0x2e0] sm:$0xff]  ;;  %355 = vmatpush.msra.mxu3 %v257_v21  ;;  %v253_v28 = vld [vmem:[%s1388_s5 + $0x1b0] sm:$0xff]  ;;  %v294_v21 = vld [vmem:[%s1388_s5 + $0x2f8] sm:$0xff] }
   0xc   :  { %v99_v12 = vld.sshfl [vmem:[#allocation1 + $0x8] sm:$0xff pattern:$0x75316420]  ;;  %v98_v13 = vld.sshfl [vmem:[#allocation1] sm:$0xff pattern:$0x75316420]  ;;  %336 = vmatpush.msra.mxu2 %v223_v23 }
   0xd   :  { %694 = vmatpush.msk.msra.mxu1 %vm106_vm1, %v98_v13  ;;  %v100_v15 = vld.sshfl [vmem:[#allocation1 + $0x10] sm:$0xff pattern:$0x75316420]  ;;  %356 = vmatpush.msra.mxu3 %v255_v24  ;;  %v287_v29 = vld [vmem:[%s1388_s5 + $0x2c0] sm:$0xff]  ;;  %v220_v23 = vld [vmem:[%s1388_s5 + $0xa8] sm:$0xff] }
   0xe   :  { %v219_v30 = vld [vmem:[%s1388_s5 + $0xa0] sm:$0xff]  ;;  %337 = vmatpush.msra.mxu2 %v221_v27  ;;  %v285_v32 = vld [vmem:[%s1388_s5 + $0x2b0] sm:$0xff]  ;;  %v101_v38 = vld.sshfl [vmem:[#allocation1 + $0x18] sm:$0xff pattern:$0x75316420] }
   0xf   :  { %698 = vmatpush.msk.msrb.mxu1 %vm106_vm1, %v100_v15  ;;  %v251_v31 = vld [vmem:[%s1388_s5 + $0x1a0] sm:$0xff]  ;;  %357 = vmatpush.msra.mxu3 %v253_v28  ;;  %v217_v33 = vld [vmem:[%s1388_s5 + $0x90] sm:$0xff]  ;;  %v224_v15 = vld [vmem:[%s1388_s5 + $0xc8] sm:$0xff] }
  0x10   :  { %v249_v34 = vld [vmem:[%s1388_s5 + $0x190] sm:$0xff]  ;;  %338 = vmatpush.msra.mxu2 %v219_v30  ;;  %v283_v35 = vld [vmem:[%s1388_s5 + $0x2a0] sm:$0xff]  ;;  %v252_v24 = vld [vmem:[%s1388_s5 + $0x1a8] sm:$0xff] }
  0x11   :  { %358 = vmatpush.msra.mxu3 %v251_v31  ;;  %v215_v36 = vld [vmem:[%s1388_s5 + $0x80] sm:$0xff]  ;;  %v213_v39 = vld [vmem:[%s1388_s5 + $0x70] sm:$0xff]  ;;  %v218_v27 = vld [vmem:[%s1388_s5 + $0x98] sm:$0xff] }
  0x12   :  { %v247_v37 = vld [vmem:[%s1388_s5 + $0x180] sm:$0xff]  ;;  %339 = vmatpush.msra.mxu2 %v217_v33  ;;  %v245_v41 = vld [vmem:[%s1388_s5 + $0x170] sm:$0xff]  ;;  %v250_v28 = vld [vmem:[%s1388_s5 + $0x198] sm:$0xff] }
  0x13   :  { %359 = vmatpush.msra.mxu3 %v249_v34  ;;  %v281_v42 = vld [vmem:[%s1388_s5 + $0x290] sm:$0xff]  ;;  %v211_v43 = vld [vmem:[%s1388_s5 + $0x60] sm:$0xff]  ;;  %v216_v31 = vld [vmem:[%s1388_s5 + $0x88] sm:$0xff] }
  0x14   :  { %340 = vmatpush.msra.mxu2 %v215_v36  ;;  %v243_v44 = vld [vmem:[%s1388_s5 + $0x160] sm:$0xff]  ;;  %v209_v46 = vld [vmem:[%s1388_s5 + $0x50] sm:$0xff]  ;;  %v288_v33 = vld [vmem:[%s1388_s5 + $0x2c8] sm:$0xff] }
  0x15   :  { %360 = vmatpush.msra.mxu3 %v247_v37  ;;  %v279_v45 = vld [vmem:[%s1388_s5 + $0x280] sm:$0xff]  ;;  %v241_v47 = vld [vmem:[%s1388_s5 + $0x150] sm:$0xff]  ;;  %v246_v36 = vld [vmem:[%s1388_s5 + $0x178] sm:$0xff] }
  0x16   :  { %341 = vmatpush.msra.mxu2 %v213_v39  ;;  %v277_v48 = vld [vmem:[%s1388_s5 + $0x270] sm:$0xff]  ;;  %v207_v49 = vld [vmem:[%s1388_s5 + $0x40] sm:$0xff]  ;;  %v286_v37 = vld [vmem:[%s1388_s5 + $0x2b8] sm:$0xff] }
  0x17   :  { %361 = vmatpush.msra.mxu3 %v245_v41  ;;  %v239_v50 = vld [vmem:[%s1388_s5 + $0x140] sm:$0xff]  ;;  %v325_v51 = vld [vmem:[%s1388_s5 + $0x3f0] sm:$0xff]  ;;  %v326_v41 = vld [vmem:[%s1388_s5 + $0x3f8] sm:$0xff] }
  0x18   :  { %342 = vmatpush.msra.mxu2 %v211_v43  ;;  %v205_v52 = vld [vmem:[%s1388_s5 + $0x30] sm:$0xff]  ;;  %v275_v54 = vld [vmem:[%s1388_s5 + $0x260] sm:$0xff]  ;;  %v244_v43 = vld [vmem:[%s1388_s5 + $0x168] sm:$0xff] }
  0x19   :  { %362 = vmatpush.msra.mxu3 %v243_v44  ;;  %v237_v53 = vld [vmem:[%s1388_s5 + $0x130] sm:$0xff]  ;;  %v323_v55 = vld [vmem:[%s1388_s5 + $0x3e0] sm:$0xff]  ;;  %v284_v44 = vld [vmem:[%s1388_s5 + $0x2a8] sm:$0xff] }
  0x1a   :  { %343 = vmatpush.msra.mxu2 %v209_v46  ;;  %v203_v56 = vld [vmem:[%s1388_s5 + $0x20] sm:$0xff]  ;;  %v273_v58 = vld [vmem:[%s1388_s5 + $0x250] sm:$0xff]  ;;  %v210_v46 = vld [vmem:[%s1388_s5 + $0x58] sm:$0xff] }
  0x1b   :  { %363 = vmatpush.msra.mxu3 %v241_v47  ;;  %v235_v57 = vld [vmem:[%s1388_s5 + $0x120] sm:$0xff]  ;;  %v321_v59 = vld [vmem:[%s1388_s5 + $0x3d0] sm:$0xff]  ;;  %v242_v47 = vld [vmem:[%s1388_s5 + $0x158] sm:$0xff] }
  0x1c   :  { %344 = vmatpush.msra.mxu2 %v207_v49  ;;  %v201_v60 = vld [vmem:[%s1388_s5 + $0x10] sm:$0xff]  ;;  %v271_v62 = vld [vmem:[%s1388_s5 + $0x240] sm:$0xff]  ;;  %v322_v49 = vld [vmem:[%s1388_s5 + $0x3d8] sm:$0xff] }
  0x1d   :  { %364 = vmatpush.msra.mxu3 %v239_v50  ;;  %v233_v61 = vld [vmem:[%s1388_s5 + $0x110] sm:$0xff]  ;;  %v319_v63 = vld [vmem:[%s1388_s5 + $0x3c0] sm:$0xff]  ;;  %v208_v50 = vld [vmem:[%s1388_s5 + $0x48] sm:$0xff] }
  0x1e   :  { %345 = vmatpush.msra.mxu2 %v205_v52  ;;  %v199_v0 = vld [vmem:[%s1388_s5] sm:$0xff]  ;;  %v317_v2 = vld [vmem:[%s1388_s5 + $0x3b0] sm:$0xff]  ;;  %v280_v52 = vld [vmem:[%s1388_s5 + $0x288] sm:$0xff] }
  0x1f   :  { %365 = vmatpush.msra.mxu3 %v237_v53  ;;  %v231_v1 = vld [vmem:[%s1388_s5 + $0x100] sm:$0xff]  ;;  %v265_v13 = vld [vmem:[%s1388_s5 + $0x210] sm:$0xff]  ;;  %v320_v53 = vld [vmem:[%s1388_s5 + $0x3c8] sm:$0xff] }
  0x20   :  { %346 = vmatpush.msra.mxu2 %v203_v56  ;;  %v311_v14 = vld [vmem:[%s1388_s5 + $0x380] sm:$0xff]  ;;  %v309_v18 = vld [vmem:[%s1388_s5 + $0x370] sm:$0xff]  ;;  %v278_v56 = vld [vmem:[%s1388_s5 + $0x278] sm:$0xff] }
  0x21   :  { %366 = vmatpush.msra.mxu3 %v235_v57  ;;  %v263_v17 = vld [vmem:[%s1388_s5 + $0x200] sm:$0xff]  ;;  %v301_v34 = vld [vmem:[%s1388_s5 + $0x330] sm:$0xff]  ;;  %v318_v57 = vld [vmem:[%s1388_s5 + $0x3b8] sm:$0xff] }
  0x22   :  { %347 = vmatpush.msra.mxu2 %v201_v60  ;;  %v303_v30 = vld [vmem:[%s1388_s5 + $0x340] sm:$0xff]  ;;  %v297_v39 = vld [vmem:[%s1388_s5 + $0x310] sm:$0xff]  ;;  %v276_v60 = vld [vmem:[%s1388_s5 + $0x268] sm:$0xff] }
  0x23   :  { %367 = vmatpush.msra.mxu3 %v233_v61  ;;  %v316_v61 = vld [vmem:[%s1388_s5 + $0x3a8] sm:$0xff] }
  0x24   :  { %348 = vmatpush.msra.mxu2 %v199_v0  ;;  %v274_v0 = vld [vmem:[%s1388_s5 + $0x258] sm:$0xff] }
  0x25   :  { %368 = vmatpush.msra.mxu3 %v231_v1  ;;  %v314_v1 = vld [vmem:[%s1388_s5 + $0x398] sm:$0xff] }
  0x75   :  { %v49_v3 = vpop.xlane.xlu0 %48 }
  0x76   :  { %v51_v5 = vmul.f32 0.00048828125, %v49_v3  ;;  %v230_v3 = vld [vmem:[%s1388_s5 + $0xf8] sm:$0xff] }
  0x77   :  { %413 = vmatpush.msrb.mxu2 %v230_v3  ;;  %v232_v3 = vld [vmem:[%s1388_s5 + $0x108] sm:$0xff] }
  0x78   :  { %v55_v6 = vmul.f32 %v53_v4, %v51_v5  ;;  %v262_v4 = vld [vmem:[%s1388_s5 + $0x1f8] sm:$0xff]  ;;  %v269_v5 = vld [vmem:[%s1388_s5 + $0x230] sm:$0xff] }
  0x79   :  { %433 = vmatpush.msrb.mxu3 %v262_v4  ;;  %v272_v4 = vld [vmem:[%s1388_s5 + $0x248] sm:$0xff] }
  0x7a   :  { %75 = vmatpush.msra.mxu0 %v55_v6  ;;  %v315_v6 = vld [vmem:[%s1388_s5 + $0x3a0] sm:$0xff] }
  0x7d   :  { %v47_v7 = vpop.xlane.xlu0 %46 }
  0x7e   :  { %v50_v9 = vmul.f32 0.00048828125, %v47_v7  ;;  %v228_v7 = vld [vmem:[%s1388_s5 + $0xe8] sm:$0xff] }
  0x7f   :  { %414 = vmatpush.msrb.mxu2 %v228_v7  ;;  %v310_v7 = vld [vmem:[%s1388_s5 + $0x378] sm:$0xff] }
  0x80   :  { %v54_v10 = vmul.f32 %v52_v8, %v50_v9  ;;  %v260_v8 = vld [vmem:[%s1388_s5 + $0x1e8] sm:$0xff]  ;;  %v267_v9 = vld [vmem:[%s1388_s5 + $0x220] sm:$0xff] }
  0x81   :  { %434 = vmatpush.msrb.mxu3 %v260_v8  ;;  %v268_v8 = vld [vmem:[%s1388_s5 + $0x228] sm:$0xff] }
  0x82   :  { %76 = vmatpush.msra.mxu0 %v54_v10  ;;  %v313_v10 = vld [vmem:[%s1388_s5 + $0x390] sm:$0xff] }
  0x83   :  { %693 = vmatmul.msk.f32.vlgmr.msra.gmra.mxu0 %vm57_vm0, %v56_v11  ;;  %v226_v11 = vld [vmem:[%s1388_s5 + $0xd8] sm:$0xff] }
  0x84   :  { %696 = vmatpush.msk.msrb.mxu0 %vm106_vm1, %v99_v12  ;;  %v258_v12 = vld [vmem:[%s1388_s5 + $0x1d8] sm:$0xff]  ;;  %415 = vmatpush.msrb.mxu2 %v226_v11 }
  0x85   :  { %435 = vmatpush.msrb.mxu3 %v258_v12  ;;  %v306_v11 = vld [vmem:[%s1388_s5 + $0x358] sm:$0xff]  ;;  %v264_v12 = vld [vmem:[%s1388_s5 + $0x208] sm:$0xff] }
  0x86   :  { %373 = vmatpush.msra.mxu0 %v293_v22  ;;  %416 = vmatpush.msrb.mxu2 %v224_v15  ;;  %v307_v22 = vld [vmem:[%s1388_s5 + $0x360] sm:$0xff]  ;;  %v300_v15 = vld [vmem:[%s1388_s5 + $0x328] sm:$0xff] }
  0x87   :  { %436 = vmatpush.msrb.mxu3 %v256_v16  ;;  %v298_v16 = vld [vmem:[%s1388_s5 + $0x318] sm:$0xff] }
  0x88   :  { %374 = vmatpush.msra.mxu0 %v291_v25  ;;  %417 = vmatpush.msrb.mxu2 %v222_v19  ;;  %v292_v25 = vld [vmem:[%s1388_s5 + $0x2e8] sm:$0xff] }
  0x89   :  { %437 = vmatpush.msrb.mxu3 %v254_v20 }
  0x8a   :  { %375 = vmatpush.msra.mxu0 %v289_v26  ;;  %v305_v26 = vld [vmem:[%s1388_s5 + $0x350] sm:$0xff]  ;;  %418 = vmatpush.msrb.mxu2 %v220_v23 }
  0x8b   :  { %438 = vmatpush.msrb.mxu3 %v252_v24 }
  0x8c   :  { %376 = vmatpush.msra.mxu0 %v287_v29  ;;  %v290_v29 = vld [vmem:[%s1388_s5 + $0x2d8] sm:$0xff]  ;;  %419 = vmatpush.msrb.mxu2 %v218_v27 }
  0x8d   :  { %439 = vmatpush.msrb.mxu3 %v250_v28 }
  0x8e   :  { %377 = vmatpush.msra.mxu0 %v285_v32  ;;  %v248_v32 = vld [vmem:[%s1388_s5 + $0x188] sm:$0xff]  ;;  %420 = vmatpush.msrb.mxu2 %v216_v31 }
  0x8f   :  { %440 = vmatpush.msrb.mxu3 %v248_v32 }
  0x90   :  { %378 = vmatpush.msra.mxu0 %v283_v35  ;;  %v214_v35 = vld [vmem:[%s1388_s5 + $0x78] sm:$0xff] }
  0x91   :  { %421 = vmatpush.msrb.mxu2 %v214_v35  ;;  %441 = vmatpush.msrb.mxu3 %v246_v36  ;;  %v327_v35 = vld [vmem:[%s1389_s6] sm:$0x3]  ;;  %s668_s6 = sshll.u32 %s1394_s11, 4  ;;  %s669_s6 = int_to_ptr.hbm [resolvable:$true] %s668_s6 }
  0x92   :  { %379 = vmatpush.msra.mxu0 %v281_v42  ;;  %v212_v42 = vld [vmem:[%s1388_s5 + $0x68] sm:$0xff]  ;;  %v329_v36 = vperm.slane %v327_v35, 0 }
  0x93   :  { %422 = vmatpush.msrb.mxu2 %v212_v42  ;;  %442 = vmatpush.msrb.mxu3 %v244_v43  ;;  %v330_v43 = vperm.slane %v327_v35, 1  ;;  %v588_v35 = vld [vmem:[%s1392_s9 + $0x20] sm:$0xff] }
  0x94   :  { %380 = vmatpush.msra.mxu0 %v279_v45  ;;  %v324_v45 = vld [vmem:[%s1388_s5 + $0x3e8] sm:$0xff] }
  0x95   :  { %423 = vmatpush.msrb.mxu2 %v210_v46  ;;  %443 = vmatpush.msrb.mxu3 %v242_v47 }
  0x96   :  { %381 = vmatpush.msra.mxu0 %v277_v48  ;;  %v282_v48 = vld [vmem:[%s1388_s5 + $0x298] sm:$0xff] }
  0x97   :  { %424 = vmatpush.msrb.mxu2 %v208_v50 }
  0x98   :  { %382 = vmatpush.msra.mxu0 %v275_v54  ;;  %v206_v54 = vld [vmem:[%s1388_s5 + $0x38] sm:$0xff] }
  0x99   :  { %425 = vmatpush.msrb.mxu2 %v206_v54 }
  0x9a   :  { %383 = vmatpush.msra.mxu0 %v273_v58  ;;  %v204_v58 = vld [vmem:[%s1388_s5 + $0x28] sm:$0xff] }
  0x9b   :  { %426 = vmatpush.msrb.mxu2 %v204_v58 }
  0x9c   :  { %384 = vmatpush.msra.mxu0 %v271_v62  ;;  %v202_v62 = vld [vmem:[%s1388_s5 + $0x18] sm:$0xff] }
  0x9d   :  { %427 = vmatpush.msrb.mxu2 %v202_v62 }
  0x9e   :  { %385 = vmatpush.msra.mxu0 %v269_v5  ;;  %v312_v5 = vld [vmem:[%s1388_s5 + $0x388] sm:$0xff] }
  0xa0   :  { %386 = vmatpush.msra.mxu0 %v267_v9  ;;  %v308_v9 = vld [vmem:[%s1388_s5 + $0x368] sm:$0xff] }
  0xa2   :  { %387 = vmatpush.msra.mxu0 %v265_v13  ;;  %v304_v13 = vld [vmem:[%s1388_s5 + $0x348] sm:$0xff] }
  0xa4   :  { %388 = vmatpush.msra.mxu0 %v263_v17  ;;  %v83_v17 = vld [vmem:[%s1387_s4] sm:$0xf]  ;;  %s666_s4 = sshll.u32 %s766_s28, 4  ;;  %s667_s4 = int_to_ptr.vmem [resolvable:$true] %s666_s4 }
  0xa5   :  { %v85_v19 = vperm.slane %v83_v17, 0  ;;  %v86_v20 = vperm.slane %v83_v17, 1  ;;  %v87_v27 = vperm.slane %v83_v17, 2  ;;  %v88_v31 = vperm.slane %v83_v17, 3 }
 0x100   :  { %v78_v40 = vpop.f32.mrf.mxu0 }
 0x101   :  { %695 = vmatmul.msk.f32.vlgmr.msra.gmra.mxu1 %vm102_vm2, %v78_v40  ;;  %697 = vmatmul.msk.f32.vlgmr.msrb.gmra.mxu0 %vm102_vm2, %v78_v40 }
 0x102   :  { %700 = vmatpush.msk.msra.mxu1 %vm106_vm1, %v101_v38  ;;  %453 = vmatpush.msrb.mxu0 %v294_v21  ;;  %v299_v38 = vld [vmem:[%s1388_s5 + $0x320] sm:$0xff] }
 0x104   :  { %454 = vmatpush.msrb.mxu0 %v292_v25 }
 0x106   :  { %455 = vmatpush.msrb.mxu0 %v290_v29 }
 0x108   :  { %456 = vmatpush.msrb.mxu0 %v288_v33 }
 0x109   :  { %699 = vmatmul.msk.f32.vlgmr.msrb.gmra.mxu1 %vm102_vm2, %v78_v40 }
 0x10a   :  { %393 = vmatpush.msrb.mxu1 %v325_v51  ;;  %457 = vmatpush.msrb.mxu0 %v286_v37  ;;  %v240_v51 = vld [vmem:[%s1388_s5 + $0x148] sm:$0xff]  ;;  %v764_v37 = vmov 4.0  }
 0x10b   :  { %444 = vmatpush.msrb.mxu3 %v240_v51  ;;  %706 = vrcp.f32 %v764_v37 }
 0x10c   :  { %394 = vmatpush.msrb.mxu1 %v323_v55  ;;  %458 = vmatpush.msrb.mxu0 %v284_v44  ;;  %v238_v55 = vld [vmem:[%s1388_s5 + $0x138] sm:$0xff] }
 0x10d   :  { %445 = vmatpush.msrb.mxu3 %v238_v55 }
 0x10e   :  { %395 = vmatpush.msrb.mxu1 %v321_v59  ;;  %459 = vmatpush.msrb.mxu0 %v282_v48  ;;  %v236_v59 = vld [vmem:[%s1388_s5 + $0x128] sm:$0xff] }
 0x10f   :  { %446 = vmatpush.msrb.mxu3 %v236_v59 }
 0x110   :  { %396 = vmatpush.msrb.mxu1 %v319_v63  ;;  %460 = vmatpush.msrb.mxu0 %v280_v52  ;;  %v234_v63 = vld [vmem:[%s1388_s5 + $0x118] sm:$0xff] }
 0x111   :  { %701 = vmatmul.msk.f32.vlgmr.msra.gmra.mxu1 %vm102_vm2, %v78_v40  ;;  %v295_v40 = vld [vmem:[%s1388_s5 + $0x300] sm:$0xff]  ;;  %447 = vmatpush.msrb.mxu3 %v234_v63 }
 0x112   :  { %397 = vmatpush.msrb.mxu1 %v317_v2  ;;  %461 = vmatpush.msrb.mxu0 %v278_v56  ;;  %v200_v2 = vld [vmem:[%s1388_s5 + $0x8] sm:$0xff] }
 0x113   :  { %428 = vmatpush.msrb.mxu2 %v200_v2  ;;  %448 = vmatpush.msrb.mxu3 %v232_v3 }
 0x114   :  { %398 = vmatpush.msrb.mxu1 %v315_v6  ;;  %462 = vmatpush.msrb.mxu0 %v276_v60  ;;  %v270_v6 = vld [vmem:[%s1388_s5 + $0x238] sm:$0xff] }
 0x116   :  { %399 = vmatpush.msrb.mxu1 %v313_v10  ;;  %463 = vmatpush.msrb.mxu0 %v274_v0  ;;  %v266_v10 = vld [vmem:[%s1388_s5 + $0x218] sm:$0xff] }
 0x118   :  { %400 = vmatpush.msrb.mxu1 %v311_v14  ;;  %464 = vmatpush.msrb.mxu0 %v272_v4  ;;  %v302_v14 = vld [vmem:[%s1388_s5 + $0x338] sm:$0xff] }
 0x11a   :  { %401 = vmatpush.msrb.mxu1 %v309_v18  ;;  %465 = vmatpush.msrb.mxu0 %v270_v6  ;;  %v296_v18 = vld [vmem:[%s1388_s5 + $0x308] sm:$0xff]  ;;  %v615_v6 = vld [vmem:[%s1392_s9 + $0xf8] sm:$0xff] }
 0x11c   :  { %402 = vmatpush.msrb.mxu1 %v307_v22  ;;  %466 = vmatpush.msrb.mxu0 %v268_v8 }
 0x11e   :  { %403 = vmatpush.msrb.mxu1 %v305_v26  ;;  %467 = vmatpush.msrb.mxu0 %v266_v10  ;;  %v594_v10 = vld [vmem:[%s1392_s9 + $0x50] sm:$0xff] }
 0x120   :  { %404 = vmatpush.msrb.mxu1 %v303_v30  ;;  %468 = vmatpush.msrb.mxu0 %v264_v12 }
 0x122   :  { %405 = vmatpush.msrb.mxu1 %v301_v34 }
 0x124   :  { %406 = vmatpush.msrb.mxu1 %v299_v38 }
 0x126   :  { %407 = vmatpush.msrb.mxu1 %v297_v39 }
 0x128   :  { %408 = vmatpush.msrb.mxu1 %v295_v40 }
 0x12a   :  { %473 = vmatpush.msra.mxu1 %v326_v41  ;;  %v707_v41 = vpop.eup %706 }
 0x12b   :  { %vm512_vm3 = vweird.f32 %v707_v41 }
 0x12c   :  { %474 = vmatpush.msra.mxu1 %v324_v45  ;;  %v508_v45 = vmul.f32 4.0, %v707_v41 }
 0x12e   :  { %475 = vmatpush.msra.mxu1 %v322_v49  ;;  %v509_v51 = vsub.f32 1.0, %v508_v45 }
 0x130   :  { %476 = vmatpush.msra.mxu1 %v320_v53  ;;  %v599_v53 = vld [vmem:[%s1392_s9 + $0x78] sm:$0xff]  ;;  %v510_v58 = vmul.f32 %v707_v41, %v509_v51  ;;  %v584_v51 = vld [vmem:[%s1392_s9] sm:$0xff] }
 0x132   :  { %477 = vmatpush.msra.mxu1 %v318_v57  ;;  %v598_v57 = vld [vmem:[%s1392_s9 + $0x70] sm:$0xff]  ;;  %v511_v2 = vadd.f32 %v707_v41, %v510_v58 }
 0x133   :  { %v602_v58 = vld [vmem:[%s1392_s9 + $0x90] sm:$0xff] }
 0x134   :  { %478 = vmatpush.msra.mxu1 %v316_v61  ;;  %v597_v61 = vld [vmem:[%s1392_s9 + $0x68] sm:$0xff]  ;;  %v1277_v12 = vsel %vm512_vm3, %v707_v41, %v511_v2 }
 0x136   :  { %479 = vmatpush.msra.mxu1 %v314_v1  ;;  %v596_v1 = vld [vmem:[%s1392_s9 + $0x60] sm:$0xff] }
 0x138   :  { %480 = vmatpush.msra.mxu1 %v312_v5  ;;  %v595_v5 = vld [vmem:[%s1392_s9 + $0x58] sm:$0xff] }
 0x13a   :  { %481 = vmatpush.msra.mxu1 %v310_v7 }
 0x13c   :  { %482 = vmatpush.msra.mxu1 %v308_v9 }
 0x13e   :  { %483 = vmatpush.msra.mxu1 %v306_v11  ;;  %v614_v11 = vld [vmem:[%s1392_s9 + $0xf0] sm:$0xff] }
 0x140   :  { %484 = vmatpush.msra.mxu1 %v304_v13 }
 0x142   :  { %485 = vmatpush.msra.mxu1 %v302_v14 }
 0x144   :  { %486 = vmatpush.msra.mxu1 %v300_v15  ;;  %v593_v15 = vld [vmem:[%s1392_s9 + $0x48] sm:$0xff] }
 0x146   :  { %487 = vmatpush.msra.mxu1 %v298_v16  ;;  %v613_v16 = vld [vmem:[%s1392_s9 + $0xe8] sm:$0xff] }
 0x148   :  { %488 = vmatpush.msra.mxu1 %v296_v18 }
 0x17e   :  { %v132_v21 = vpop.f32.mrf.mxu1  ;;  %v152_v22 = vpop.f32.mrf.mxu0 }
 0x17f   :  { %v133_v23 = vadd.f32 %v132_v21, %v85_v19  ;;  %v153_v24 = vadd.f32 %v152_v22, %v86_v20  ;;  %v592_v19 = vld [vmem:[%s1392_s9 + $0x40] sm:$0xff] }
 0x180   :  { %v612_v20 = vld [vmem:[%s1392_s9 + $0xe0] sm:$0xff] }
 0x181   :  { %v195_v25 = vmax.f32 %v133_v23, 0.0  ;;  %v196_v26 = vmax.f32 %v153_v24, 0.0  ;;  %v591_v23 = vld [vmem:[%s1392_s9 + $0x38] sm:$0xff] }
 0x182   :  { %v611_v24 = vld [vmem:[%s1392_s9 + $0xd8] sm:$0xff] }
 0x183   :  { %349 = vmatmul.f32.vlgmr.msra.gmra.mxu2 %v195_v25  ;;  %369 = vmatmul.f32.vlgmr.msra.gmra.mxu3 %v196_v26 }
 0x184   :  { %620 = vmatpush.msra.mxu2 %v599_v53  ;;  %640 = vmatpush.msra.mxu3 %v615_v6 }
 0x186   :  { %v172_v28 = vpop.f32.mrf.mxu1  ;;  %621 = vmatpush.msra.mxu2 %v598_v57  ;;  %641 = vmatpush.msra.mxu3 %v614_v11 }
 0x187   :  { %v173_v29 = vadd.f32 %v172_v28, %v87_v27  ;;  %v590_v27 = vld [vmem:[%s1392_s9 + $0x30] sm:$0xff] }
 0x188   :  { %622 = vmatpush.msra.mxu2 %v597_v61  ;;  %642 = vmatpush.msra.mxu3 %v613_v16  ;;  %v610_v28 = vld [vmem:[%s1392_s9 + $0xd0] sm:$0xff] }
 0x189   :  { %v197_v30 = vmax.f32 %v173_v29, 0.0 }
 0x18a   :  { %623 = vmatpush.msra.mxu2 %v596_v1  ;;  %643 = vmatpush.msra.mxu3 %v612_v20 }
 0x18b   :  { %389 = vmatmul.f32.vlgmr.msra.gmra.mxu0 %v197_v30  ;;  %429 = vmatmul.f32.vlgmr.msrb.gmra.mxu2 %v195_v25 }
 0x18c   :  { %449 = vmatmul.f32.vlgmr.msrb.gmra.mxu3 %v196_v26  ;;  %624 = vmatpush.msra.mxu2 %v595_v5 }
 0x18d   :  { %644 = vmatpush.msra.mxu3 %v611_v24 }
 0x18e   :  { %v192_v32 = vpop.f32.mrf.mxu1  ;;  %625 = vmatpush.msra.mxu2 %v594_v10 }
 0x18f   :  { %v193_v33 = vadd.f32 %v192_v32, %v88_v31  ;;  %645 = vmatpush.msra.mxu3 %v610_v28  ;;  %v589_v31 = vld [vmem:[%s1392_s9 + $0x28] sm:$0xff] }
 0x190   :  { %626 = vmatpush.msra.mxu2 %v593_v15  ;;  %v609_v32 = vld [vmem:[%s1392_s9 + $0xc8] sm:$0xff] }
 0x191   :  { %v198_v34 = vmax.f32 %v193_v33, 0.0  ;;  %646 = vmatpush.msra.mxu3 %v609_v32 }
 0x192   :  { %627 = vmatpush.msra.mxu2 %v592_v19 }
 0x193   :  { %409 = vmatmul.f32.vlgmr.msrb.gmra.mxu1 %v198_v34  ;;  %469 = vmatmul.f32.vlgmr.msrb.gmra.mxu0 %v197_v30 }
 0x194   :  { %628 = vmatpush.msra.mxu2 %v591_v23 }
 0x196   :  { %629 = vmatpush.msra.mxu2 %v590_v27 }
 0x198   :  { %630 = vmatpush.msra.mxu2 %v589_v31 }
 0x19a   :  { %631 = vmatpush.msra.mxu2 %v588_v35 }
 0x19b   :  { %489 = vmatmul.f32.vlgmr.msra.gmra.mxu1 %v198_v34 }
 0x206   :  { %v350_v38 = vpop.f32.mrf.mxu2  ;;  %v370_v40 = vpop.f32.mrf.mxu3 }
 0x207   :  { %v351_v39 = vadd.f32 %v350_v38, %v329_v36  ;;  %v608_v36 = vld [vmem:[%s1392_s9 + $0xc0] sm:$0xff] }
 0x208   :  { %v390_v44 = vpop.f32.mrf.mxu0  ;;  %647 = vmatpush.msra.mxu3 %v608_v36 }
 0x209   :  { %v371_v42 = vadd.f32 %v370_v40, %v351_v39  ;;  %v587_v39 = vld [vmem:[%s1392_s9 + $0x18] sm:$0xff] }
 0x20a   :  { %v607_v40 = vld [vmem:[%s1392_s9 + $0xb8] sm:$0xff]  ;;  %632 = vmatpush.msra.mxu2 %v587_v39 }
 0x20b   :  { %v391_v47 = vadd.f32 %v390_v44, %v371_v42  ;;  %648 = vmatpush.msra.mxu3 %v607_v40  ;;  %v606_v44 = vld [vmem:[%s1392_s9 + $0xb0] sm:$0xff] }
 0x20d   :  { %649 = vmatpush.msra.mxu3 %v606_v44 }
 0x20e   :  { %v430_v46 = vpop.f32.mrf.mxu2 }
 0x20f   :  { %v431_v48 = vadd.f32 %v430_v46, %v330_v43  ;;  %v450_v52 = vpop.f32.mrf.mxu3  ;;  %v586_v43 = vld [vmem:[%s1392_s9 + $0x10] sm:$0xff] }
 0x210   :  { %v410_v49 = vpop.f32.mrf.mxu1  ;;  %v470_v60 = vpop.f32.mrf.mxu0  ;;  %633 = vmatpush.msra.mxu2 %v586_v43 }
 0x211   :  { %v411_v50 = vadd.f32 %v410_v49, %v391_v47  ;;  %v451_v54 = vadd.f32 %v450_v52, %v431_v48  ;;  %v585_v47 = vld [vmem:[%s1392_s9 + $0x8] sm:$0xff]  ;;  %v604_v52 = vld [vmem:[%s1392_s9 + $0xa0] sm:$0xff] }
 0x212   :  { %v605_v48 = vld [vmem:[%s1392_s9 + $0xa8] sm:$0xff]  ;;  %634 = vmatpush.msra.mxu2 %v585_v47 }
 0x213   :  { %v493_v55 = vsel %vm106_vm1, %v411_v50, 0.0  ;;  %v471_v62 = vadd.f32 %v470_v60, %v451_v54  ;;  %650 = vmatpush.msra.mxu3 %v605_v48 }
 0x214   :  { %v494_v56 = vrot.slane %v493_v55, 4  ;;  %635 = vmatpush.msra.mxu2 %v584_v51 }
 0x215   :  { %651 = vmatpush.msra.mxu3 %v604_v52 }
 0x216   :  { %v495_v59 = vadd.f32 %v494_v56, %v493_v55  ;;  %v603_v55 = vld [vmem:[%s1392_s9 + $0x98] sm:$0xff] }
 0x217   :  { %652 = vmatpush.msra.mxu3 %v603_v55 }
 0x218   :  { %v496_v63 = vrot.slane %v495_v59, 2  ;;  %v490_v0 = vpop.f32.mrf.mxu1 }
 0x219   :  { %v491_v3 = vadd.f32 %v490_v0, %v471_v62  ;;  %653 = vmatpush.msra.mxu3 %v602_v58  ;;  %v600_v62 = vld [vmem:[%s1392_s9 + $0x80] sm:$0xff] }
 0x21a   :  { %v497_v4 = vadd.f32 %v496_v63, %v495_v59  ;;  %v601_v59 = vld [vmem:[%s1392_s9 + $0x88] sm:$0xff] }
 0x21b   :  { %v500_v7 = vsel %vm106_vm1, %v491_v3, 0.0  ;;  %654 = vmatpush.msra.mxu3 %v601_v59 }
 0x21c   :  { %v498_v8 = vrot.slane %v497_v4, 1  ;;  %v501_v9 = vrot.slane %v500_v7, 4 }
 0x21d   :  { %655 = vmatpush.msra.mxu3 %v600_v62 }
 0x21e   :  { %v499_v13 = vadd.f32 %v498_v8, %v497_v4  ;;  %v502_v14 = vadd.f32 %v501_v9, %v500_v7  ;;  %v560_v8 = vld [vmem:[%s1390_s7] sm:$0x3]  ;;  %s765_s7 = smov [#allocation4]  }
 0x21f   :  { %v563_v24 = vperm.slane %v560_v8, 1 }
 0x220   :  { %v514_v17 = vmul.f32 %v1277_v12, %v499_v13  ;;  %v503_v18 = vrot.slane %v502_v14, 2  ;;  %v562_v13 = vperm.slane %v560_v8, 0 }
 0x222   :  { %v1292_v21 = vsub.f32 %v411_v50, %v514_v17  ;;  %v504_v22 = vadd.f32 %v503_v18, %v502_v14 }
 0x224   :  { %v518_v25 = vmul.f32 %v1292_v21, %v1292_v21  ;;  %v505_v26 = vrot.slane %v504_v22, 1 }
 0x226   :  { %v520_v29 = vsel %vm106_vm1, %v518_v25, 0.0  ;;  %v506_v30 = vadd.f32 %v505_v26, %v504_v22 }
 0x227   :  { %v521_v33 = vrot.slane %v520_v29, 4 }
 0x228   :  { %v515_v34 = vmul.f32 %v1277_v12, %v506_v30 }
 0x229   :  { %v522_v37 = vadd.f32 %v521_v33, %v520_v29  ;;  %v705_v33 = vld [vmem:[%s1393_s10] ss:$0 sm:$0xff] }
 0x22a   :  { %v1322_v38 = vsub.f32 %v491_v3, %v515_v34 }
 0x22b   :  { %v523_v41 = vrot.slane %v522_v37, 2 }
 0x22c   :  { %v519_v42 = vmul.f32 %v1322_v38, %v1322_v38 }
 0x22d   :  { %v524_v45 = vadd.f32 %v523_v41, %v522_v37 }
 0x22e   :  { %v527_v46 = vsel %vm106_vm1, %v519_v42, 0.0 }
 0x22f   :  { %v525_v49 = vrot.slane %v524_v45, 1  ;;  %v528_v50 = vrot.slane %v527_v46, 4 }
 0x231   :  { %v526_v53 = vadd.f32 %v525_v49, %v524_v45  ;;  %v529_v54 = vadd.f32 %v528_v50, %v527_v46 }
 0x233   :  { %v534_v56 = vmul.f32 %v526_v53, %v1277_v12  ;;  %v530_v57 = vrot.slane %v529_v54, 2 }
 0x235   :  { %v536_v60 = vadd.f32 1e-05, %v534_v56  ;;  %v531_v61 = vadd.f32 %v530_v57, %v529_v54 }
 0x237   :  { %708 = vrsqrt.f32 %v536_v60  ;;  %v532_v63 = vrot.slane %v531_v61, 1  ;;  %vm544_vm5 = vweird.f32 %v536_v60 }
 0x239   :  { %v533_v0 = vadd.f32 %v532_v63, %v531_v61 }
 0x23b   :  { %v535_v1 = vmul.f32 %v533_v0, %v1277_v12  ;;  %v568_v12 = vld [vmem:[%s1391_s8] sm:$0x3]  ;;  %s677_s8 = sshll.u32 %s765_s7, 4  ;;  %s678_s8 = int_to_ptr.vmem [resolvable:$true] %s677_s8 }
 0x23c   :  { %v570_v17 = vperm.slane %v568_v12, 0  ;;  %v571_v28 = vperm.slane %v568_v12, 1 }
 0x23d   :  { %v709_v2 = vpop.eup %708  ;;  %v537_v3 = vadd.f32 1e-05, %v535_v1 }
 0x23e   :  { %v539_v4 = vmul.f32 %v709_v2, %v536_v60  ;;  %vm545_vm4 = vweird.f32 %v709_v2 }
 0x23f   :  { %710 = vrsqrt.f32 %v537_v3  ;;  %vm546_vm6 = vmor %vm544_vm5, %vm545_vm4  ;;  %vm554_vm8 = vweird.f32 %v537_v3 }
 0x240   :  { %v540_v5 = vmul.f32 %v709_v2, %v539_v4 }
 0x242   :  { %v541_v6 = vmul.f32 0.5, %v540_v5 }
 0x244   :  { %v542_v7 = vsub.f32 1.5, %v541_v6 }
 0x245   :  { %v711_v9 = vpop.eup %710 }
 0x246   :  { %v543_v10 = vmul.f32 %v709_v2, %v542_v7  ;;  %v549_v11 = vmul.f32 %v711_v9, %v537_v3  ;;  %vm555_vm7 = vweird.f32 %v711_v9 }
 0x247   :  { %vm556_vm9 = vmor %vm554_vm8, %vm555_vm7 }
 0x248   :  { %v547_v14 = vsel %vm546_vm6, %v709_v2, %v543_v10  ;;  %v550_v15 = vmul.f32 %v711_v9, %v549_v11 }
 0x249   :  { %v558_v16 = vmul.f32 %v547_v14, %v1292_v21 }
 0x24a   :  { %v551_v18 = vmul.f32 0.5, %v550_v15 }
 0x24b   :  { %v566_v19 = vmul.f32 %v562_v13, %v558_v16 }
 0x24c   :  { %v552_v20 = vsub.f32 1.5, %v551_v18 }
 0x24d   :  { %v574_v22 = vadd.f32 %v570_v17, %v566_v19 }
 0x24e   :  { %v553_v23 = vmul.f32 %v711_v9, %v552_v20 }
 0x24f   :  { %v576_v25 = vmax.f32 %v574_v22, 0.0 }
 0x250   :  { %v557_v26 = vsel %vm556_vm9, %v711_v9, %v553_v23 }
 0x251   :  { %v559_v27 = vmul.f32 %v557_v26, %v1322_v38  ;;  %636 = vmatmul.f32.vlgmr.msra.gmra.mxu2 %v576_v25 }
 0x253   :  { %v567_v29 = vmul.f32 %v563_v24, %v559_v27 }
 0x255   :  { %v575_v30 = vadd.f32 %v571_v28, %v567_v29 }
 0x257   :  { %v577_v31 = vmax.f32 %v575_v30, 0.0 }
 0x259   :  { %656 = vmatmul.f32.vlgmr.msra.gmra.mxu3 %v577_v31  ;;  %v580_v21 = vrot.slane %v577_v31, 4 }
 0x25b   :  { %v581_v32 = vsel %vm106_vm1, %v576_v25, %v580_v21 }
 0x25c   :  { %583 = vst [vmem:[#allocation4] sm:$0xff] %v581_v32 }
 0x25d   :  { %682 = dma.vmem_to_hbm [thread:$0]  %s678_s8, 128, %s680_s25, [#allocation5]  }
 0x2d4   :  { %v637_v34 = vpop.f32.mrf.mxu2 }
 0x2d5   :  { %v638_v35 = vadd.f32 %v705_v33, %v637_v34 }
 0x2dc   :  { %v657_v36 = vpop.f32.mrf.mxu3 }
 0x2dd   :  { %v658_v37 = vadd.f32 %v657_v36, %v638_v35 }
 0x2df   :  { %660 = vst [vmem:[#allocation2] sm:$0xf] %v658_v37 }
 0x2e0   :  { %671 = dma.vmem_to_hbm [thread:$0]  %s667_s4, 64, %s669_s6, [#allocation3]  }
 0x2e1   :  { %760 = dma.done.wait [#allocation3], 64  }
 0x2e2   :  { %761 = vsyncadd [#allocation3], 4294967232 }
 0x2e3   :  { %762 = dma.done.wait [#allocation5], 128  }
 0x2e4   :  { %763 = vsyncadd [#allocation5], 4294967168 }
 0x2e5   :  { %691 = vsyncpa [#allocation3], 1 }
 0x2e6   :  { %692 = vsyncpa [#allocation5], 1 }

</bundles_post_ra>
